<compile_context>
chip_gen: v7x
topology: tpu7x:2x2x1
jax: 0.10.0
libtpu: 0.0.40
codegen_flags: <defaults>
</compile_context>

<pallas_src>
import math

import jax
import jax.numpy as jnp
from jax.experimental import pallas as pl
from jax.experimental.pallas import tpu as pltpu


# ---------------------------------------------------------------------------
# Kernels
# ---------------------------------------------------------------------------
def _attn_pool_kernel(x_ref, m_ref, w1t_ref, b1_ref, w2_ref, w3t_ref, b3_ref,
                      o_ref):
    TB, S, H = x_ref.shape
    x = x_ref[...]                                        # (TB, S, H) native dtype
    m = m_ref[...][:, :, 0].astype(jnp.float32)           # (TB, S)

    # input_proj: fused over TB examples -> one (TB*S, H) @ (H, H) MXU matmul
    x2d = x.reshape(TB * S, H)
    h = jnp.tanh(
        jnp.dot(x2d, w1t_ref[...], preferred_element_type=jnp.float32)
        + b1_ref[...].astype(jnp.float32))                # (TB*S, H) f32

    # score: lane reduce on the VPU/XLU instead of an N=1 MXU matmul
    w2 = w2_ref[...].astype(jnp.float32).reshape(1, 1, H)
    s = jnp.sum(h.reshape(TB, S, H) * w2, axis=-1)        # (TB, S)

    # masked softmax over the sequence axis
    s = jnp.where(m > 0, s, -10000.0)
    s = s - jnp.max(s, axis=-1, keepdims=True)
    e = jnp.exp(s)
    p = e * pl.reciprocal(jnp.sum(e, axis=-1, keepdims=True), approx=True)

    # pooled_x = p^T x ; softmax weights sum to 1, so the output projection can
    # be applied AFTER pooling:  sum_s p_s (x_s W3 + b3) == (p^T x) W3 + b3.
    pooled = jnp.sum(p[:, :, None] * x.astype(jnp.float32), axis=1)   # (TB, H)

    out = (jnp.dot(pooled.astype(w3t_ref.dtype), w3t_ref[...],
                   preferred_element_type=jnp.float32)
           + b3_ref[...].astype(jnp.float32))             # (TB, H)
    o_ref[...] = out.astype(o_ref.dtype)


def _avg_pool_kernel(x_ref, m_ref, o_ref):
    x = x_ref[...].astype(jnp.float32)                    # (TB, S, H)
    m = m_ref[...].astype(jnp.float32)                    # (TB, S, 1)
    num = jnp.sum(x * m, axis=1)                          # (TB, H)
    den = jnp.sum(m, axis=1)                              # (TB, 1)
    # NOTE: no guard for an all-masked row (matches the PyTorch module).
    o_ref[...] = (num * pl.reciprocal(den, approx=True)).astype(o_ref.dtype)


# ---------------------------------------------------------------------------
# Tiling heuristic
# ---------------------------------------------------------------------------
def _choose_tb(batch, seq):
    """Batch tile per grid step.

    Targets TB*S ~ 128 MXU rows, keeps the (TB, H) output block tile-friendly
    (TB == B or TB % 8 == 0), and keeps >= 2 grid steps when possible so the
    'parallel' grid axis can shard across TensorCores (v7x megacore).
    """
    target = max(1, 128 // max(seq, 1))
    divisors = [d for d in range(1, batch + 1) if batch % d == 0]
    cands = [d for d in divisors if d == batch or d % 8 == 0]
    under = [d for d in cands if d <= target]
    tb = max(under) if under else min(cands)
    if batch // tb < 2:
        smaller = [d for d in cands if d < tb and batch // d >= 2]
        if smaller:
            tb = max(smaller)
    return tb


# ---------------------------------------------------------------------------
# Wrappers
# ---------------------------------------------------------------------------
def attn_pooling(x, mask, w1, b1, w2, w3, b3, *, tb=None):
    """AttnPooling forward. Weights use the PyTorch convention W: (out, in)."""
    B, S, H = x.shape
    tb = _choose_tb(B, S) if tb is None else tb
    assert B % tb == 0, (B, tb)

    # Pre-transpose so the kernel does plain row-major matmuls.
    w1t = jnp.asarray(w1).T                    # (H, H)
    w2r = jnp.asarray(w2).reshape(1, H)        # (1, H)  (used as a lane reduce)
    w3t = jnp.asarray(w3).T                    # (H, H)
    b1r = jnp.asarray(b1).reshape(1, H)
    b3r = jnp.asarray(b3).reshape(1, H)

    # Weight blocks have constant index maps; on VMEM-tight parts (v7x) they
    # could additionally use pipeline_mode=pl.Buffered(1) / bf16 storage and
    # vmem_limit_bytes could be raised when growing `tb`.
    return pl.pallas_call(
        _attn_pool_kernel,
        out_shape=jax.ShapeDtypeStruct((B, H), x.dtype),
        grid_spec=pltpu.PrefetchScalarGridSpec(
            num_scalar_prefetch=0,
            grid=(B // tb,),
            in_specs=[
                pl.BlockSpec((tb, S, H), lambda b: (b, 0, 0)),   # x
                pl.BlockSpec((tb, S, 1), lambda b: (b, 0, 0)),   # mask
                pl.BlockSpec((H, H), lambda b: (0, 0)),          # W1^T
                pl.BlockSpec((1, H), lambda b: (0, 0)),          # b1
                pl.BlockSpec((1, H), lambda b: (0, 0)),          # W2 row
                pl.BlockSpec((H, H), lambda b: (0, 0)),          # W3^T
                pl.BlockSpec((1, H), lambda b: (0, 0)),          # b3
            ],
            out_specs=pl.BlockSpec((tb, H), lambda b: (b, 0)),
        ),
        compiler_params=pltpu.CompilerParams(
            dimension_semantics=("parallel",)),
    )(x, mask, w1t, b1r, w2r, w3t, b3r)


def average_pooling(x, mask, *, tb=None):
    """AveragePooling forward (dim=1)."""
    B, S, H = x.shape
    tb = _choose_tb(B, S) if tb is None else tb
    assert B % tb == 0, (B, tb)
    return pl.pallas_call(
        _avg_pool_kernel,
        out_shape=jax.ShapeDtypeStruct((B, H), x.dtype),
        grid_spec=pltpu.PrefetchScalarGridSpec(
            num_scalar_prefetch=0,
            grid=(B // tb,),
            in_specs=[
                pl.BlockSpec((tb, S, H), lambda b: (b, 0, 0)),
                pl.BlockSpec((tb, S, 1), lambda b: (b, 0, 0)),
            ],
            out_specs=pl.BlockSpec((tb, H), lambda b: (b, 0)),
        ),
        compiler_params=pltpu.CompilerParams(
            dimension_semantics=("parallel",)),
    )(x, mask)


def pooling_layer(pooling, x, mask, params=None):
    """PoolingLayer.forward equivalent."""
    if pooling == 'attn':
        return attn_pooling(x, mask, *params)
    elif pooling == 'avg':
        return average_pooling(x, mask)
    raise NotImplementedError(pooling)


# ---------------------------------------------------------------------------
# Pure-JAX references (for correctness check)
# ---------------------------------------------------------------------------
def _ref_attn(x, mask, w1, b1, w2, w3, b3):
    m = mask.astype(jnp.float32)
    h = jnp.tanh(jnp.einsum('bsh,oh->bso', x, w1) + b1)
    s = jnp.einsum('bsh,oh->bso', h, w2)                      # (B, S, 1)
    s = s * m + (-10000.0) * (1.0 - m)
    s = jax.nn.softmax(s, axis=1)
    feat = jnp.einsum('bsh,oh->bso', x, w3) + b3              # (B, S, H)
    return jnp.squeeze(jnp.einsum('bsk,bsh->bkh', s, feat), axis=1)


def _ref_avg(x, mask):
    m = mask.astype(jnp.float32)
    return jnp.sum(x * m, axis=1) / jnp.sum(m, axis=1)


# ---------------------------------------------------------------------------
if __name__ == "__main__":
    B, S, H = 16, 8, 128                       # batch, seq, proj_hidden_size
    key = jax.random.PRNGKey(0)
    kx, km, k1, k2, k3 = jax.random.split(key, 5)

    x = jax.random.normal(kx, (B, S, H), dtype=jnp.float32)
    mask = (jax.random.uniform(km, (B, S, 1)) > 0.3).astype(jnp.float32)
    mask = mask.at[:, 0, :].set(1.0)           # ensure at least one valid token

    # Deterministic parameter init (torch: normal std=sqrt(1/in)*coeff, bias=0)
    std = math.sqrt(1.0 / H)
    w1 = jax.random.normal(k1, (H, H), dtype=jnp.float32) * std   # Linear(H->H)
    b1 = jnp.zeros((H,), dtype=jnp.float32)
    w2 = jax.random.normal(k2, (1, H), dtype=jnp.float32) * std   # Linear(H->1)
    w3 = jax.random.normal(k3, (H, H), dtype=jnp.float32) * std   # Linear(H->H)
    b3 = jnp.zeros((H,), dtype=jnp.float32)
    params = (w1, b1, w2, w3, b3)

    # attn pooling path
    out_attn = jax.block_until_ready(pooling_layer('attn', x, mask, params))
    ref_attn = _ref_attn(x, mask, *params)
    assert out_attn.shape == (B, H)
    assert jnp.allclose(out_attn, ref_attn, atol=2e-3, rtol=2e-3), \
        float(jnp.max(jnp.abs(out_attn - ref_attn)))

    # avg pooling path
    out_avg = jax.block_until_ready(pooling_layer('avg', x, mask))
    ref_avg = _ref_avg(x, mask)
    assert out_avg.shape == (B, H)
    assert jnp.allclose(out_avg, ref_avg, atol=2e-3, rtol=2e-3), \
        float(jnp.max(jnp.abs(out_avg - ref_avg)))

    print("KERNEL_OK")
</pallas_src>

<mosaic_0001>
module attributes {stable_mosaic.version = 11 : i64} {
  func.func @_attn_pool_kernel(%arg0: i32, %arg1: memref<8x8x128xf32, #tpu.memory_space<vmem>>, %arg2: memref<8x8x1xf32, #tpu.memory_space<vmem>>, %arg3: memref<128x128xf32, #tpu.memory_space<vmem>>, %arg4: memref<1x128xf32, #tpu.memory_space<vmem>>, %arg5: memref<1x128xf32, #tpu.memory_space<vmem>>, %arg6: memref<128x128xf32, #tpu.memory_space<vmem>>, %arg7: memref<1x128xf32, #tpu.memory_space<vmem>>, %arg8: memref<8x128xf32, #tpu.memory_space<vmem>>) attributes {dimension_semantics = [#tpu.dimension_semantics<parallel>], iteration_bounds = array<i64: 2>, scalar_prefetch = 0 : i64, scratch_operands = 0 : i64, tpu.core_type = #tpu.core_type<tc>, window_params = [{transform_indices = @transform_0, window_bounds = array<i64: 8, 8, 128>}, {transform_indices = @transform_1, window_bounds = array<i64: 8, 8, 1>}, {pipeline_mode = #tpu.pipeline_mode<synchronous>, transform_indices = @transform_2, window_bounds = array<i64: 128, 128>}, {pipeline_mode = #tpu.pipeline_mode<synchronous>, transform_indices = @transform_3, window_bounds = array<i64: 1, 128>}, {pipeline_mode = #tpu.pipeline_mode<synchronous>, transform_indices = @transform_4, window_bounds = array<i64: 1, 128>}, {pipeline_mode = #tpu.pipeline_mode<synchronous>, transform_indices = @transform_5, window_bounds = array<i64: 128, 128>}, {pipeline_mode = #tpu.pipeline_mode<synchronous>, transform_indices = @transform_6, window_bounds = array<i64: 1, 128>}, {transform_indices = @transform_7, window_bounds = array<i64: 8, 128>}]} {
    %c0 = arith.constant 0 : index
    %c0_0 = arith.constant 0 : index
    %c0_1 = arith.constant 0 : index
    %0 = vector.load %arg1[%c0, %c0_0, %c0_1] : memref<8x8x128xf32, #tpu.memory_space<vmem>>, vector<8x8x128xf32>
    %c0_2 = arith.constant 0 : index
    %c0_3 = arith.constant 0 : index
    %c0_4 = arith.constant 0 : index
    %1 = vector.load %arg2[%c0_2, %c0_3, %c0_4] : memref<8x8x1xf32, #tpu.memory_space<vmem>>, vector<8x8x1xf32>
    %2 = vector.shape_cast %1 : vector<8x8x1xf32> to vector<8x8xf32>
    %3 = vector.shape_cast %0 : vector<8x8x128xf32> to vector<64x128xf32>
    %c0_5 = arith.constant 0 : index
    %c0_6 = arith.constant 0 : index
    %4 = vector.load %arg3[%c0_5, %c0_6] : memref<128x128xf32, #tpu.memory_space<vmem>>, vector<128x128xf32>
    %cst = arith.constant dense<0.000000e+00> : vector<64x128xf32>
    %5 = tpu.matmul %3, %4, %cst {dimension_numbers = #tpu.dot_dimension_numbers<[1], [0], [0], [1], [0, 0, 1, 1], [], []>} : vector<64x128xf32>, vector<128x128xf32>, vector<64x128xf32> -> vector<64x128xf32>
    %c0_7 = arith.constant 0 : index
    %c0_8 = arith.constant 0 : index
    %6 = vector.load %arg4[%c0_7, %c0_8] : memref<1x128xf32, #tpu.memory_space<vmem>>, vector<1x128xf32>
    %7 = vector.broadcast %6 : vector<1x128xf32> to vector<64x128xf32>
    %8 = arith.addf %5, %7 : vector<64x128xf32>
    %9 = math.tanh %8 : vector<64x128xf32>
    %c0_9 = arith.constant 0 : index
    %c0_10 = arith.constant 0 : index
    %10 = vector.load %arg5[%c0_9, %c0_10] : memref<1x128xf32, #tpu.memory_space<vmem>>, vector<1x128xf32>
    %11 = vector.shape_cast %10 : vector<1x128xf32> to vector<1x1x128xf32>
    %12 = vector.shape_cast %9 : vector<64x128xf32> to vector<8x8x128xf32>
    %13 = vector.broadcast %11 : vector<1x1x128xf32> to vector<8x8x128xf32>
    %14 = arith.mulf %12, %13 : vector<8x8x128xf32>
    %cst_11 = arith.constant dense<0.000000e+00> : vector<8x8xf32>
    %15 = vector.multi_reduction <add>, %14, %cst_11 [2] : vector<8x8x128xf32> to vector<8x8xf32>
    %cst_12 = arith.constant 0.000000e+00 : f32
    %16 = vector.broadcast %cst_12 : f32 to vector<8x8xf32>
    %17 = arith.cmpf ogt, %2, %16 : vector<8x8xf32>
    %cst_13 = arith.constant -1.000000e+04 : f32
    %18 = vector.broadcast %cst_13 : f32 to vector<8x8xf32>
    %19 = arith.select %17, %15, %18 : vector<8x8xi1>, vector<8x8xf32>
    %cst_14 = arith.constant dense<0xFF800000> : vector<8xf32>
    %20 = vector.multi_reduction <maximumf>, %19, %cst_14 [1] : vector<8x8xf32> to vector<8xf32>
    %21 = vector.shape_cast %20 : vector<8xf32> to vector<8x1xf32>
    %22 = vector.broadcast %21 : vector<8x1xf32> to vector<8x8xf32>
    %23 = arith.subf %19, %22 : vector<8x8xf32>
    %24 = math.exp %23 : vector<8x8xf32>
    %cst_15 = arith.constant dense<0.000000e+00> : vector<8xf32>
    %25 = vector.multi_reduction <add>, %24, %cst_15 [1] : vector<8x8xf32> to vector<8xf32>
    %26 = vector.shape_cast %25 : vector<8xf32> to vector<8x1xf32>
    %27 = tpu.reciprocal %26 {approx = true} : vector<8x1xf32> -> vector<8x1xf32>
    %28 = vector.broadcast %27 : vector<8x1xf32> to vector<8x8xf32>
    %29 = arith.mulf %24, %28 : vector<8x8xf32>
    %30 = vector.shape_cast %29 : vector<8x8xf32> to vector<8x8x1xf32>
    %31 = vector.broadcast %30 : vector<8x8x1xf32> to vector<8x8x128xf32>
    %32 = arith.mulf %31, %0 : vector<8x8x128xf32>
    %cst_16 = arith.constant dense<0.000000e+00> : vector<8x128xf32>
    %33 = vector.multi_reduction <add>, %32, %cst_16 [1] : vector<8x8x128xf32> to vector<8x128xf32>
    %c0_17 = arith.constant 0 : index
    %c0_18 = arith.constant 0 : index
    %34 = vector.load %arg6[%c0_17, %c0_18] : memref<128x128xf32, #tpu.memory_space<vmem>>, vector<128x128xf32>
    %cst_19 = arith.constant dense<0.000000e+00> : vector<8x128xf32>
    %35 = tpu.matmul %33, %34, %cst_19 {dimension_numbers = #tpu.dot_dimension_numbers<[1], [0], [0], [1], [0, 0, 1, 1], [], []>} : vector<8x128xf32>, vector<128x128xf32>, vector<8x128xf32> -> vector<8x128xf32>
    %c0_20 = arith.constant 0 : index
    %c0_21 = arith.constant 0 : index
    %36 = vector.load %arg7[%c0_20, %c0_21] : memref<1x128xf32, #tpu.memory_space<vmem>>, vector<1x128xf32>
    %37 = vector.broadcast %36 : vector<1x128xf32> to vector<8x128xf32>
    %38 = arith.addf %35, %37 : vector<8x128xf32>
    %c0_22 = arith.constant 0 : index
    %c0_23 = arith.constant 0 : index
    %39 = vector.load %arg8[%c0_22, %c0_23] : memref<8x128xf32, #tpu.memory_space<vmem>>, vector<8x128xf32>
    tpu.vector_store %arg8[%c0_22, %c0_23], %38 {strides = array<i32>} : memref<8x128xf32, #tpu.memory_space<vmem>>, vector<8x128xf32>,
    return
  }
  func.func @transform_0(%arg0: i32) -> (i32, i32, i32) {
    %c0_i32 = arith.constant 0 : i32
    %c0_i32_0 = arith.constant 0 : i32
    %c0_i32_1 = arith.constant 0 : i32
    return %arg0, %c0_i32, %c0_i32_0 : i32, i32, i32
  }
  func.func @transform_1(%arg0: i32) -> (i32, i32, i32) {
    %c0_i32 = arith.constant 0 : i32
    %c0_i32_0 = arith.constant 0 : i32
    %c0_i32_1 = arith.constant 0 : i32
    return %arg0, %c0_i32, %c0_i32_0 : i32, i32, i32
  }
  func.func @transform_2(%arg0: i32) -> (i32, i32) {
    %c0_i32 = arith.constant 0 : i32
    %c0_i32_0 = arith.constant 0 : i32
    %c0_i32_1 = arith.constant 0 : i32
    return %c0_i32, %c0_i32_0 : i32, i32
  }
  func.func @transform_3(%arg0: i32) -> (i32, i32) {
    %c0_i32 = arith.constant 0 : i32
    %c0_i32_0 = arith.constant 0 : i32
    %c0_i32_1 = arith.constant 0 : i32
    return %c0_i32, %c0_i32_0 : i32, i32
  }
  func.func @transform_4(%arg0: i32) -> (i32, i32) {
    %c0_i32 = arith.constant 0 : i32
    %c0_i32_0 = arith.constant 0 : i32
    %c0_i32_1 = arith.constant 0 : i32
    return %c0_i32, %c0_i32_0 : i32, i32
  }
  func.func @transform_5(%arg0: i32) -> (i32, i32) {
    %c0_i32 = arith.constant 0 : i32
    %c0_i32_0 = arith.constant 0 : i32
    %c0_i32_1 = arith.constant 0 : i32
    return %c0_i32, %c0_i32_0 : i32, i32
  }
  func.func @transform_6(%arg0: i32) -> (i32, i32) {
    %c0_i32 = arith.constant 0 : i32
    %c0_i32_0 = arith.constant 0 : i32
    %c0_i32_1 = arith.constant 0 : i32
    return %c0_i32, %c0_i32_0 : i32, i32
  }
  func.func @transform_7(%arg0: i32) -> (i32, i32) {
    %c0_i32 = arith.constant 0 : i32
    %c0_i32_0 = arith.constant 0 : i32
    return %arg0, %c0_i32 : i32, i32
  }
}

</mosaic_0001>

<bundles_post_ra>
// kernel: tpu_custom_call.1
= control target key start
LH: loop header
LB: loop body
LE: loop exit
PB: predicated region body
PF: predicated region fallthrough
CT: control target
= control target key end

     0   :  { %12 = vsyncpa [#allocation3], 0  ;;  %s1955_s0 = inlined_call_operand.vmem [shape: f32[16,8,128], index: 0, kind: input, shape index: {}]   ;;  %s1956_s1 = inlined_call_operand.vmem [shape: f32[16,8,1], index: 1, kind: input, shape index: {}]   ;;  %s1957_s2 = inlined_call_operand.hbm [shape: f32[128,128], index: 2, kind: input, shape index: {}]   ;;  %s1958_s3 = inlined_call_operand.vmem [shape: f32[1,128], index: 3, kind: input, shape index: {}]   ;;  %s1959_s4 = inlined_call_operand.vmem [shape: f32[1,128], index: 4, kind: input, shape index: {}]   ;;  %s1960_s5 = inlined_call_operand.hbm [shape: f32[128,128], index: 5, kind: input, shape index: {}]   ;;  %s1961_s6 = inlined_call_operand.vmem [shape: f32[1,128], index: 6, kind: input, shape index: {}]   ;;  %s1962_s7 = inlined_call_operand.hbm [shape: f32[16,128], index: 7, kind: output, shape index: {}]  }
   0x1   :  { %13 = vsyncpa [#allocation6], 0 }
   0x2   :  { %14 = vsyncpa [#allocation4], 0 }
   0x3   :  { %16 = vsyncpa [#allocation4 + $0x1], 0  ;;  %s1593_s24 = smov 0   ;;  %s1595_s25 = smov 0  }
   0x4   :  { %s1597_s26 = smov 0   ;;  %s1599_s27 = smov 0  }
   0x5 LB: > { %s1614_s28 = sadd.s32 4294967295, %s1542_s27   ;;  %s1118_s29 = sadd.s32 4294967294, %s1542_s27   ;;  %s1542_s27 = sphi %s1599_s27, %s1982_s27   ;;  %s1538_s26 = sphi %s1597_s26, %s1981_s26   ;;  %s1534_s25 = sphi %s1595_s25, %s1980_s25   ;;  %s1530_s24 = sphi %s1593_s24, %s1979_s24  }
   0x6   : > { %s1618_s30 = sadd.s32 1, %s1542_s27   ;;  %s186_s8 = sadd.s32 1, %s1538_s26 }
   0x7   : > { %s183_s9 = ssub.s32 %s1542_s27, %s1618_s30  ;;  %p196_p0 = scmp.ne.s32.totalorder %s1538_s26, %s1534_s25 }
   0x8   : > { %p184_p1 = scmp.eq.s32.totalorder %s183_s9, 0  ;;  %p197_p2 = scmp.eq.s32.totalorder %s1614_s28, 1 }
   0x9   : > { %p202_p3 = scmp.ne.s32.totalorder %s1534_s25, %s1530_s24  ;;  %p203_p4 = scmp.eq.s32.totalorder %s1118_s29, 1 }
   0xa   : > { %s1629_s10 = scalar_select %p184_p1, %s1538_s26, %s186_s8  }
   0xb   : > { %p1631_p5 = por %p197_p2, %p196_p0  ;;  %p1635_p6 = por %p203_p4, %p202_p3 }
   0xc   : > { %1966 = sst [smem:[#allocation11_spill]] %s1629_s10  ;;  %p1119_p7 = scmp.ge.s32.totalorder %s1542_s27, 1 }
   0xd   : > { %s1967_s11 = scalar_select %p1631_p5, 1, 0 }
   0xe   : > { %s1968_s12 = scalar_select %p1635_p6, 1, 0 }
   0xf   : > { %p210_p8 = scmp.lt.s32.totalorder %s1542_s27, 3  ;;  %p1963_p9 = scmp.eq.s32.totalorder %s1614_s28, 0 }
  0x10   : > { %s1544_s14 = smov [#allocation2]   ;;  %s1545_s17 = smov [#allocation5]  }
  0x11   : > { %p1642_p10 = pnand %p1119_p7, %p210_p8  ;;  %s222_s15 = sshll.u32 %s1544_s14, 4  ;;  %s223_s15 = int_to_ptr.vmem [resolvable:$true] %s222_s15 }
  0x12   : > { %s241_s18 = sshll.u32 %s1545_s17, 4  ;;  %s1416_s21 = scalar_lea.hbm %s1957_s2, 2048  ;;  %s1654_s18 = int_to_ptr.vmem [resolvable:$true] %s241_s18 }
  0x13   : > { %s1969_s13 = scalar_select %p1642_p10, 1, 0 }
  0x14   : > { %p1324_p11 = pneg %p1642_p10  ;;  %p1417_p13 = scmp.ne.s32.totalorder %s1957_s2, %s1416_s21 }
  0x15   : > { %p1423_p3 = scmp.lt.u32.totalorder %s1416_s21, %s1957_s2 }
  0x16   : > { %p1650_p12 = pnand %p1963_p9, %p1324_p11 }
  0x18   : > { %p1418_p0 = pneg %p1650_p12 }
  0x1a   : > { %p1419_p1 = pnand %p1418_p0, %p1417_p13 }
  0x1c   : > { %p1420_p2 = pneg %p1419_p1 }
  0x1e   : > { %p1425_p4 = pnand %p1423_p3, %p1420_p2 }
  0x20   : > { %1428 = shalt.err (!%p1425_p4)
}
  0x21   : > { %s1429_s9 = scalar_lea.vmem %s223_s15, 2048  ;;  %p1437_p9 = scmp.lt.s32.totalorder %s223_s15, %s223_s15 }
  0x22   : > { %p1430_p7 = scmp.ne.s32.totalorder %s223_s15, %s1429_s9  ;;  %p1438_p6 = scmp.lt.s32.totalorder %s1429_s9, %s1429_s9 }
  0x24   : > { %p1432_p8 = pnand %p1430_p7, %p1418_p0  ;;  %p1439_p5 = por %p1438_p6, %p1437_p9 }
  0x26   : > { %p1433_p11 = pneg %p1432_p8 }
  0x28   : > { %p1440_p10 = pnand %p1439_p5, %p1433_p11 }
  0x2a   : > { %1443 = shalt.err (!%p1440_p10)
}
  0x2b   : > { %s1546_s14 = smov 128   ;;  %s1547_s17 = smov 8  }
  0x2c   : > { %1327 = dma.hbm_to_vmem [thread:$0]  (!%p1650_p12), %s1957_s2, 2048, %s223_s15, [#allocation3], %s1546_s14, %s1546_s14, %s1547_s17  }
  0x2d   : > { %s1444_s23 = scalar_lea.hbm %s1960_s5, 2048 }
  0x2e   : > { %p1445_p13 = scmp.ne.s32.totalorder %s1960_s5, %s1444_s23  ;;  %p1451_p9 = scmp.lt.u32.totalorder %s1444_s23, %s1960_s5 }
  0x30   : > { %p1447_p5 = pnand %p1445_p13, %p1418_p0 }
  0x32   : > { %p1448_p6 = pneg %p1447_p5 }
  0x34   : > { %p1453_p10 = pnand %p1451_p9, %p1448_p6 }
  0x36   : > { %1456 = shalt.err (!%p1453_p10)
}
  0x37   : > { %s1457_s15 = scalar_lea.vmem %s1654_s18, 2048  ;;  %p1465_p4 = scmp.lt.s32.totalorder %s1654_s18, %s1654_s18 }
  0x38   : > { %p1458_p1 = scmp.ne.s32.totalorder %s1654_s18, %s1457_s15  ;;  %p1466_p7 = scmp.lt.s32.totalorder %s1457_s15, %s1457_s15 }
  0x3a   : > { %p1460_p2 = pnand %p1458_p1, %p1418_p0  ;;  %p1467_p8 = por %p1466_p7, %p1465_p4 }
  0x3c   : > { %p1461_p3 = pneg %p1460_p2 }
  0x3e   : > { %p1468_p11 = pnand %p1467_p8, %p1461_p3 }
  0x40   : > { %1471 = shalt.err (!%p1468_p11)
}
  0x41   : > { %1330 = dma.hbm_to_vmem [thread:$0]  (!%p1650_p12), %s1960_s5, 2048, %s1654_s18, [#allocation6], %s1546_s14, %s1546_s14, %s1547_s17  }
  0x42   : > { %p1971_p13 = scmp.ne.s32.totalorder %s1969_s13, 0 }
  0x43   : > { %p1972_p5 = scmp.eq.s32.totalorder (!%p1971_p13), %s1614_s28, 0 }
  0x44   : > { %278 = sbr.rel (%p1971_p13) target bundleno = 1512 (0x5e8), region = 48 }
  0x4b   : > { %1517 = dma.done.wait (%p1972_p5), [#allocation3], 2048   ;;  %p1973_p0 = pmov %p1972_p5 }
  0x4d   : > { %1519 = vsyncadd (%p1973_p0), [#allocation3], 4294965248  ;;  %p1974_p6 = pmov %p1973_p0 }
  0x4e   : > { %p1975_p9 = pmov %p1973_p0 }
  0x4f   : > { %1521 = dma.done.wait (%p1974_p6), [#allocation6], 2048  }
  0x50   : > { %1523 = vsyncadd (%p1975_p9), [#allocation6], 4294965248  ;;  %s1127_s16 = sshll.u32 %s1614_s28, 3  ;;  %v347_v0 = vld [vmem:[#allocation2] sm:$0xff]  ;;  %v348_v1 = vld [vmem:[#allocation2 + $0x8] sm:$0xff]  ;;  %vm596_vm8 = vcmask 1041409  }
  0x51   : > { %p320_p10 = scmp.lt.s32.totalorder %s1127_s16, 15  ;;  %v349_v2 = vld [vmem:[#allocation2 + $0x10] sm:$0xff]  ;;  %v1258_v3 = vpack.c.bf16 %v348_v1, %v347_v0  ;;  %v350_v4 = vld [vmem:[#allocation2 + $0x18] sm:$0xff]  ;;  %v351_v6 = vld [vmem:[#allocation2 + $0x20] sm:$0xff]  ;;  %vm598_vm9 = vcmask 1042434   ;;  %vm600_vm10 = vcmask 1043459  }
  0x52   : > { %v1262_v5 = vpack.c.bf16 %v350_v4, %v349_v2  ;;  %v352_v7 = vld [vmem:[#allocation2 + $0x28] sm:$0xff]  ;;  %v353_v10 = vld [vmem:[#allocation2 + $0x30] sm:$0xff]  ;;  %v354_v11 = vld [vmem:[#allocation2 + $0x38] sm:$0xff]  ;;  %v1548_v2 = vmov 0   ;;  %vm602_vm11 = vcmask 1044484   ;;  %vm604_vm12 = vcmask 1045509  }
  0x53   : > { %s1984_s16 = smov (!%p320_p10, %s1127_s16), 15  ;;  %1259 = vmatprep.subr.bf16.mxu0 %v1258_v3  ;;  %v1266_v8 = vpack.c.bf16 %v352_v7, %v351_v6  ;;  %v1270_v12 = vpack.c.bf16 %v354_v11, %v353_v10  ;;  %v355_v13 = vld [vmem:[#allocation2 + $0x40] sm:$0xff]  ;;  %v356_v14 = vld [vmem:[#allocation2 + $0x48] sm:$0xff]  ;;  %v357_v16 = vld [vmem:[#allocation2 + $0x50] sm:$0xff]  ;;  %1381 = vset.pattern.permute.xlu1 %v1548_v2  ;;  %vm606_vm13 = vcmask 1046534   ;;  %vm608_vm14 = vcmask 1047559  }
  0x54   : > { %s1128_s13 = sshll.u32 %s1984_s16, 3  ;;  %1261 = vmatpush3.bf16.msra.mxu0 %v1258_v3  ;;  %v1274_v15 = vpack.c.bf16 %v356_v14, %v355_v13  ;;  %v358_v17 = vld [vmem:[#allocation2 + $0x58] sm:$0xff]  ;;  %v359_v19 = vld [vmem:[#allocation2 + $0x60] sm:$0xff]  ;;  %v360_v20 = vld [vmem:[#allocation2 + $0x68] sm:$0xff]  ;;  %1380 = vset.pattern.permute.xlu0 %v1548_v2  ;;  %vm611_vm15 = vcmask 64512   ;;  %s316_s15 = sand.u32 1, %s1534_s25  }
  0x55   : > { %s1722_s17 = scalar_lea.vmem %s1955_s0, %s1128_s13  ;;  %1263 = vmatprep.subr.bf16.mxu0 %v1262_v5  ;;  %v1278_v18 = vpack.c.bf16 %v358_v17, %v357_v16  ;;  %v1282_v21 = vpack.c.bf16 %v360_v20, %v359_v19  ;;  %v361_v22 = vld [vmem:[#allocation2 + $0x70] sm:$0xff]  ;;  %v362_v23 = vld [vmem:[#allocation2 + $0x78] sm:$0xff]  ;;  %v1131_v32 = vld [vmem:[%s1958_s3] ss:$0 sm:$0xff]  ;;  %s1767_s9 = scalar_lea.vmem %s1956_s1, %s1128_s13 }
  0x56   : > { %v1725_v9 = vld [vmem:[%s1722_s17] sm:$0xff]  ;;  %v1286_v24 = vpack.c.bf16 %v362_v23, %v361_v22  ;;  %v1729_v25 = vld [vmem:[%s1722_s17 + $0x8] sm:$0xff]  ;;  %v1732_v26 = vld [vmem:[%s1722_s17 + $0x10] sm:$0xff]  ;;  %s1126_s10 = sshll.u32 %s316_s15, 3  ;;  %s1135_s13 = sshll.u32 %s1614_s28, 7 }
  0x57   : > { %1211 = vmatprep.mubr.f32.mxu0 %v1725_v9  ;;  %v1737_v27 = vld [vmem:[%s1722_s17 + $0x18] sm:$0xff]  ;;  %v1740_v28 = vld [vmem:[%s1722_s17 + $0x20] sm:$0xff]  ;;  %v1745_v29 = vld [vmem:[%s1722_s17 + $0x28] sm:$0xff]  ;;  %s318_s18 = scalar_lea.vmem [#allocation7], %s1126_s10  ;;  %s1913_s21 = scalar_lea.hbm %s1962_s7, %s1135_s13 }
  0x58   : > { %1265 = vmatpush3.bf16.msra.mxu0 %v1262_v5  ;;  %v1748_v30 = vld [vmem:[%s1722_s17 + $0x30] sm:$0xff]  ;;  %v1753_v31 = vld [vmem:[%s1722_s17 + $0x38] sm:$0xff]  ;;  %v1132_v45 = vld [vmem:[%s1959_s4] ss:$0 sm:$0xff]  ;;  %s1025_s14 = sshll.u32 %s318_s18, 4  ;;  %s1012_s22 = scalar_lea.sflag [#allocation4], %s316_s15  ;;  %s1915_s14 = int_to_ptr.vmem [resolvable:$true] %s1025_s14 }
  0x59   : > { %1267 = vmatprep.subr.bf16.mxu0 %v1266_v8  ;;  %v340_v3 = vld [vmem:[%s1767_s9 + $0x8] sm:$0xff]  ;;  %v342_v4 = vld [vmem:[%s1767_s9 + $0x18] sm:$0xff]  ;;  %v339_v5 = vld [vmem:[%s1767_s9] sm:$0xff]  ;;  %s1472_s23 = scalar_lea.vmem %s1915_s14, 128  ;;  %p1976_p1 = scmp.ne.s32.totalorder %s1967_s11, 0 }
  0x5a   : > { %vm515_vm0 = vcmp.gt.f32.partialorder %v340_v3, 0.0  ;;  %vm517_vm1 = vcmp.gt.f32.partialorder %v342_v4, 0.0  ;;  %vm514_vm2 = vcmp.gt.f32.partialorder %v339_v5, 0.0  ;;  %v344_v14 = vld [vmem:[%s1767_s9 + $0x28] sm:$0xff]  ;;  %v343_v17 = vld [vmem:[%s1767_s9 + $0x20] sm:$0xff]  ;;  %p1473_p12 = scmp.ne.s32.totalorder %s1915_s14, %s1472_s23  ;;  %s1552_s28 = smov [#allocation7]  }
  0x5b   : > { %vm519_vm4 = vcmp.gt.f32.partialorder %v344_v14, 0.0  ;;  %vm518_vm5 = vcmp.gt.f32.partialorder %v343_v17, 0.0  ;;  %s1476_s29 = sshll.u32 %s1552_s28, 4  ;;  %s1477_s29 = int_to_ptr.vmem [resolvable:$false] %s1476_s29 }
  0x5c   : > { %1269 = vmatpush3.bf16.msra.mxu0 %v1266_v8  ;;  %v341_v8 = vld [vmem:[%s1767_s9 + $0x10] sm:$0xff]  ;;  %p1474_p2 = pnand %p1473_p12, %p1976_p1  ;;  %s1478_s8 = scalar_lea.vmem %s1477_s29, 256 }
  0x5d   : > { %1271 = vmatprep.subr.bf16.mxu0 %v1270_v12  ;;  %vm516_vm3 = vcmp.gt.f32.partialorder %v341_v8, 0.0  ;;  %p1479_p4 = scmp.lt.s32.totalorder %s1915_s14, %s1477_s29  ;;  %p1480_p7 = scmp.lt.s32.totalorder %s1478_s8, %s1472_s23 }
  0x5e   : > { %p1475_p3 = pneg %p1474_p2 }
  0x5f   : > { %p1481_p8 = por %p1480_p7, %p1479_p4 }
  0x60   : > { %1273 = vmatpush3.bf16.msra.mxu0 %v1270_v12 }
  0x61   : > { %1275 = vmatprep.subr.bf16.mxu0 %v1274_v15  ;;  %p1482_p11 = pnand %p1481_p8, %p1475_p3 }
  0x64   : > { %1277 = vmatpush3.bf16.msra.mxu0 %v1274_v15 }
  0x65   : > { %1279 = vmatprep.subr.bf16.mxu0 %v1278_v18 }
  0x68   : > { %1281 = vmatpush3.bf16.msra.mxu0 %v1278_v18 }
  0x69   : > { %1283 = vmatprep.subr.bf16.mxu0 %v1282_v21 }
  0x6c   : > { %1285 = vmatpush3.bf16.msra.mxu0 %v1282_v21  ;;  %v345_v21 = vld [vmem:[%s1767_s9 + $0x30] sm:$0xff] }
  0x6d   : > { %1287 = vmatprep.subr.bf16.mxu0 %v1286_v24  ;;  %vm520_vm6 = vcmp.gt.f32.partialorder %v345_v21, 0.0 }
  0x70   : > { %1289 = vmatpush3.bf16.msra.mxu0 %v1286_v24  ;;  %v346_v24 = vld [vmem:[%s1767_s9 + $0x38] sm:$0xff] }
  0x71   : > { %vm521_vm7 = vcmp.gt.f32.partialorder %v346_v24, 0.0 }
  0x73   : > { %1212 = vmatmul.mubr.f32.vlgmr.msra.gmra.mrb[0].mxu0 %v1729_v25 }
  0x74   : > { %1214 = vmatprep.mubr.f32.mxu0 %v1732_v26 }
  0x77   : > { %1215 = vmatmul.mubr.f32.gmra.mrb[2].mxu0 %v1737_v27 }
  0x78   : > { %1217 = vmatprep.mubr.f32.mxu0 %v1740_v28 }
  0x7b   : > { %1218 = vmatmul.mubr.f32.gmra.mrb[4].mxu0 %v1745_v29 }
  0x7c   : > { %1220 = vmatprep.mubr.f32.mxu0 %v1748_v30 }
  0x7f   : > { %1221 = vmatmul.mubr.f32.gmra.mrb[6].mxu0 %v1753_v31 }
 0x146   : > { %v1213_v33 = vpop.f32.mrb[0].mxu0 }
 0x147   : > { %v442_v34 = vadd.f32 %v1213_v33, %v1131_v32  ;;  %v436_v35 = vpop.f32.mrb[1].mxu0 }
 0x148   : > { %v437_v36 = vadd.f32 %v1131_v32, %v436_v35 }
 0x149   : > { %1382 = vtanh.f32 %v442_v34 }
 0x14a   : > { %v1216_v37 = vpop.f32.mrb[2].mxu0  ;;  %1384 = vtanh.f32 %v437_v36  ;;  %v562_v36 = vlaneseq }
 0x14b   : > { %v452_v38 = vadd.f32 %v1216_v37, %v1131_v32  ;;  %v446_v39 = vpop.f32.mrb[3].mxu0 }
 0x14c   : > { %v447_v40 = vadd.f32 %v1131_v32, %v446_v39  ;;  %v1801_v39 = vshrl.u32 %v562_v36, 7 }
 0x14d   : > { %1386 = vtanh.f32 %v452_v38  ;;  %v563_v38 = vand.u32 127, %v562_v36 }
 0x14e   : > { %v1219_v41 = vpop.f32.mrb[4].mxu0  ;;  %1388 = vtanh.f32 %v447_v40  ;;  %v630_v5 = vsub.s32 3, %v1801_v39  ;;  %v634_v14 = vsub.s32 4, %v1801_v39  ;;  %v646_v36 = vsub.s32 7, %v1801_v39 }
 0x14f   : > { %v462_v42 = vadd.f32 %v1219_v41, %v1131_v32  ;;  %v456_v43 = vpop.f32.mrb[5].mxu0 }
 0x150   : > { %v457_v44 = vadd.f32 %v1131_v32, %v456_v43 }
 0x151   : > { %1390 = vtanh.f32 %v462_v42  ;;  %v1804_v42 = vsub.s32 %v563_v38, %v1801_v39 }
 0x152   : > { %1392 = vtanh.f32 %v457_v44  ;;  %v1222_v46 = vpop.f32.mrb[6].mxu0 }
 0x153   : > { %v1383_v47 = vpop.eup %1382  ;;  %v472_v48 = vadd.f32 %v1222_v46, %v1131_v32  ;;  %v466_v49 = vpop.f32.mrb[7].mxu0 }
 0x154   : > { %v491_v50 = vmul.f32 %v1383_v47, %v1132_v45  ;;  %v467_v51 = vadd.f32 %v1131_v32, %v466_v49  ;;  %v1385_v52 = vpop.eup %1384 }
 0x155   : > { %1394 = vtanh.f32 %v472_v48  ;;  %v490_v55 = vmul.f32 %v1385_v52, %v1132_v45 }
 0x156   : > { %500 = vadd.xlane.f32.xlu0 %v491_v50  ;;  %1396 = vtanh.f32 %v467_v51 }
 0x157   : > { %v1387_v53 = vpop.eup %1386 }
 0x158   : > { %v493_v54 = vmul.f32 %v1387_v53, %v1132_v45  ;;  %v1389_v56 = vpop.eup %1388 }
 0x159   : > { %v492_v59 = vmul.f32 %v1389_v56, %v1132_v45 }
 0x15a   : > { %504 = vadd.xlane.f32.xlu1 %v493_v54  ;;  %498 = vadd.xlane.f32.xlu0 %v490_v55 }
 0x15b   : > { %v1391_v57 = vpop.eup %1390 }
 0x15c   : > { %v1393_v58 = vpop.eup %1392  ;;  %v495_v61 = vmul.f32 %v1391_v57, %v1132_v45 }
 0x15d   : > { %v494_v60 = vmul.f32 %v1393_v58, %v1132_v45 }
 0x15e   : > { %502 = vadd.xlane.f32.xlu1 %v492_v59 }
 0x15f   : > { %v1395_v62 = vpop.eup %1394  ;;  %506 = vadd.xlane.f32.xlu0 %v494_v60 }
 0x160   : > { %v1397_v63 = vpop.eup %1396  ;;  %v497_v1 = vmul.f32 %v1395_v62, %v1132_v45 }
 0x161   : > { %v496_v0 = vmul.f32 %v1397_v63, %v1132_v45  ;;  %v618_v63 = vsub.s32 0, %v1801_v39 }
 0x162   : > { %508 = vadd.xlane.f32.xlu1 %v495_v61 }
 0x163   : > { %510 = vadd.xlane.f32.xlu0 %v496_v0  ;;  %v622_v0 = vsub.s32 1, %v1801_v39 }
 0x166   : > { %512 = vadd.xlane.f32.xlu1 %v497_v1  ;;  %v626_v1 = vsub.s32 2, %v1801_v39 }
 0x1e3   : > { %v501_v6 = vpop.xlane.xlu0 %500 }
 0x1e4   : > { %v1772_v7 = vsel %vm515_vm0, %v501_v6, -10000.0  ;;  %vm1550_vm0 = vmmov 0  }
 0x1e5   : > { %542 = vperm.xlu1 %1381, %v1772_v7  }
 0x1e7   : > { %v505_v10 = vpop.xlane.xlu1 %504  ;;  %v499_v11 = vpop.xlane.xlu0 %498 }
 0x1e8   : > { %v1776_v12 = vsel %vm517_vm1, %v505_v10, -10000.0  ;;  %v1778_v13 = vsel %vm514_vm2, %v499_v11, -10000.0 }
 0x1e9   : > { %548 = vperm.xlu1 %1381, %v1776_v12   ;;  %539 = vperm.xlu0 %1380, %v1778_v13  }
 0x1eb   : > { %v503_v15 = vpop.xlane.xlu1 %502 }
 0x1ec   : > { %v1783_v16 = vsel %vm516_vm3, %v503_v15, -10000.0  ;;  %v507_v19 = vpop.xlane.xlu0 %506 }
 0x1ed   : > { %545 = vperm.xlu1 %1381, %v1783_v16   ;;  %v1791_v23 = vsel %vm518_vm5, %v507_v19, -10000.0  ;;  %v638_v19 = vsub.s32 5, %v1801_v39 }
 0x1ef   : > { %v509_v18 = vpop.xlane.xlu1 %508 }
 0x1f0   : > { %v1787_v20 = vsel %vm519_vm4, %v509_v18, -10000.0  ;;  %v511_v22 = vpop.xlane.xlu0 %510 }
 0x1f1   : > { %554 = vperm.xlu1 %1381, %v1787_v20   ;;  %v1795_v32 = vsel %vm520_vm6, %v511_v22, -10000.0 }
 0x1f3   : > { %v513_v33 = vpop.xlane.xlu1 %512 }
 0x1f4   : > { %v1798_v34 = vsel %vm521_vm7, %v513_v33, -10000.0 }
 0x1f5   : > { %551 = vperm.xlu1 %1381, %v1791_v23  }
 0x1f9   : > { %557 = vperm.xlu1 %1381, %v1795_v32  }
 0x1fd   : > { %560 = vperm.xlu1 %1381, %v1798_v34  }
 0x264   : > { %v543_v35 = vpop.permute.xlu1 %542 }
 0x265   : > { %v571_v46 = vrot.slane %v543_v35, %v1804_v42 }
 0x268   : > { %v549_v37 = vpop.permute.xlu1 %548  ;;  %v540_v41 = vpop.permute.xlu0 %539 }
 0x269   : > { %v567_v44 = vrot.slane %v540_v41, %v1804_v42  ;;  %v579_v51 = vrot.slane %v549_v37, %v1804_v42 }
 0x26b   : > { %v597_v48 = vsel %vm596_vm8, %v571_v46, %v567_v44 }
 0x26c   : > { %v546_v40 = vpop.permute.xlu1 %545 }
 0x26d   : > { %v575_v45 = vrot.slane %v546_v40, %v1804_v42 }
 0x26f   : > { %v599_v49 = vsel %vm598_vm9, %v575_v45, %v597_v48 }
 0x270   : > { %v555_v43 = vpop.permute.xlu1 %554  ;;  %v601_v53 = vsel %vm600_vm10, %v579_v51, %v599_v49 }
 0x271   : > { %v587_v56 = vrot.slane %v555_v43, %v1804_v42 }
 0x274   : > { %v552_v47 = vpop.permute.xlu1 %551 }
 0x275   : > { %v583_v50 = vrot.slane %v552_v47, %v1804_v42 }
 0x277   : > { %v603_v54 = vsel %vm602_vm11, %v583_v50, %v601_v53 }
 0x278   : > { %v558_v52 = vpop.permute.xlu1 %557  ;;  %v605_v59 = vsel %vm604_vm12, %v587_v56, %v603_v54 }
 0x279   : > { %v591_v55 = vrot.slane %v558_v52, %v1804_v42 }
 0x27b   : > { %v607_v60 = vsel %vm606_vm13, %v591_v55, %v605_v59 }
 0x27c   : > { %v561_v57 = vpop.permute.xlu1 %560 }
 0x27d   : > { %v595_v58 = vrot.slane %v561_v57, %v1804_v42 }
 0x27f   : > { %v609_v61 = vsel %vm608_vm14, %v595_v58, %v607_v60 }
 0x280   : > { %v612_v62 = vsel %vm611_vm15, %v609_v61, -inf }
 0x281   : > { %613 = vmax.xlane.f32.xlu1 %v612_v62 }
 0x30e   : > { %v614_v2 = vpop.xlane.xlu1 %613 }
 0x30f   : > { %v619_v3 = vrot.slane %v614_v2, %v618_v63  ;;  %v623_v4 = vrot.slane %v614_v2, %v622_v0  ;;  %v627_v6 = vrot.slane %v614_v2, %v626_v1  ;;  %v631_v15 = vrot.slane %v614_v2, %v630_v5 }
 0x310   : > { %v635_v21 = vrot.slane %v614_v2, %v634_v14  ;;  %v639_v24 = vrot.slane %v614_v2, %v638_v19  ;;  %v647_v41 = vrot.slane %v614_v2, %v646_v36 }
 0x311   : > { %v656_v8 = vsub.f32 %v1778_v13, %v619_v3  ;;  %v657_v10 = vsub.f32 %v1772_v7, %v623_v4  ;;  %v658_v17 = vsub.f32 %v1783_v16, %v627_v6  ;;  %v659_v22 = vsub.f32 %v1776_v12, %v631_v15 }
 0x312   : > { %v642_v7 = vsub.s32 6, %v1801_v39  ;;  %v660_v33 = vsub.f32 %v1791_v23, %v635_v21  ;;  %v661_v12 = vsub.f32 %v1787_v20, %v639_v24  ;;  %v663_v45 = vsub.f32 %v1798_v34, %v647_v41 }
 0x313   : > { %v664_v11 = vmul.f32 1.442695, %v656_v8  ;;  %v666_v18 = vmul.f32 1.442695, %v657_v10  ;;  %v668_v13 = vmul.f32 1.442695, %v658_v17 }
 0x314   : > { %v670_v16 = vmul.f32 1.442695, %v659_v22  ;;  %v643_v37 = vrot.slane %v614_v2, %v642_v7  ;;  %v672_v38 = vmul.f32 1.442695, %v660_v33  ;;  %v674_v43 = vmul.f32 1.442695, %v661_v12 }
 0x315   : > { %1398 = vpow2.f32 %v664_v11  ;;  %v678_v20 = vmul.f32 1.442695, %v663_v45 }
 0x316   : > { %1400 = vpow2.f32 %v666_v18  ;;  %v662_v23 = vsub.f32 %v1795_v32, %v643_v37 }
 0x317   : > { %1402 = vpow2.f32 %v668_v13 }
 0x318   : > { %1404 = vpow2.f32 %v670_v16  ;;  %v676_v46 = vmul.f32 1.442695, %v662_v23 }
 0x319   : > { %1406 = vpow2.f32 %v672_v38 }
 0x31a   : > { %1408 = vpow2.f32 %v674_v43  ;;  %v902_v43 = vld [vmem:[#allocation5 + $0x8] sm:$0xff] }
 0x31b   : > { %1410 = vpow2.f32 %v676_v46  ;;  %v1549_v46 = vmov 0.0|0.0  }
 0x31c   : > { %1412 = vpow2.f32 %v678_v20  ;;  %1290 = vmatprep.subr.bf16.mxu1 %v1549_v46  ;;  %v905_v20 = vld [vmem:[#allocation5 + $0x20] sm:$0xff] }
 0x31f   : > { %v1399_v35 = vpop.eup %1398 }
 0x320   : > { %689 = vperm.xlu0 %1380, %v1399_v35   ;;  %v1401_v40 = vpop.eup %1400 }
 0x321   : > { %v1403_v44 = vpop.eup %1402 }
 0x322   : > { %v1405_v47 = vpop.eup %1404 }
 0x323   : > { %v1407_v48 = vpop.eup %1406 }
 0x324   : > { %692 = vperm.xlu0 %1380, %v1401_v40   ;;  %v1409_v49 = vpop.eup %1408 }
 0x325   : > { %v1411_v50 = vpop.eup %1410 }
 0x326   : > { %v1854_v32 = vpop.eup %1412 }
 0x328   : > { %695 = vperm.xlu0 %1380, %v1403_v44  }
 0x32c   : > { %698 = vperm.xlu0 %1380, %v1405_v47  }
 0x330   : > { %701 = vperm.xlu0 %1380, %v1407_v48  }
 0x334   : > { %704 = vperm.xlu0 %1380, %v1409_v49  }
 0x338   : > { %707 = vperm.xlu0 %1380, %v1411_v50  }
 0x33c   : > { %710 = vperm.xlu0 %1380, %v1854_v32  }
 0x39f   : > { %v690_v51 = vpop.permute.xlu0 %689 }
 0x3a0   : > { %v715_v58 = vrot.slane %v690_v51, %v1804_v42  ;;  %v907_v51 = vld [vmem:[#allocation5 + $0x30] sm:$0xff] }
 0x3a3   : > { %v693_v52 = vpop.permute.xlu0 %692 }
 0x3a4   : > { %v719_v56 = vrot.slane %v693_v52, %v1804_v42  ;;  %v908_v52 = vld [vmem:[#allocation5 + $0x38] sm:$0xff] }
 0x3a6   : > { %v744_v62 = vsel %vm596_vm8, %v719_v56, %v715_v58  ;;  %v913_v56 = vld [vmem:[#allocation5 + $0x60] sm:$0xff]  ;;  %v1551_v58 = vmov 0.0  }
 0x3a7   : > { %v696_v34 = vpop.permute.xlu0 %695  ;;  %1255 = vmatprep.mubr.msk.f32.mxu1 %vm1550_vm0, %v1551_v58 }
 0x3a8   : > { %v723_v57 = vrot.slane %v696_v34, %v1804_v42  ;;  %v1300_v34 = vpack.c.bf16 %v908_v52, %v907_v51 }
 0x3aa   : > { %v745_v3 = vsel %vm598_vm9, %v723_v57, %v744_v62  ;;  %v914_v57 = vld [vmem:[#allocation5 + $0x68] sm:$0xff] }
 0x3ab   : > { %v699_v53 = vpop.permute.xlu0 %698 }
 0x3ac   : > { %v727_v59 = vrot.slane %v699_v53, %v1804_v42  ;;  %v910_v53 = vld [vmem:[#allocation5 + $0x48] sm:$0xff] }
 0x3ae   : > { %v746_v6 = vsel %vm600_vm10, %v727_v59, %v745_v3  ;;  %v915_v59 = vld [vmem:[#allocation5 + $0x70] sm:$0xff] }
 0x3af   : > { %v702_v54 = vpop.permute.xlu0 %701 }
 0x3b0   : > { %v731_v60 = vrot.slane %v702_v54, %v1804_v42  ;;  %v912_v54 = vld [vmem:[#allocation5 + $0x58] sm:$0xff] }
 0x3b2   : > { %v747_v8 = vsel %vm602_vm11, %v731_v60, %v746_v6  ;;  %v916_v60 = vld [vmem:[#allocation5 + $0x78] sm:$0xff] }
 0x3b3   : > { %v705_v55 = vpop.permute.xlu0 %704 }
 0x3b4   : > { %v735_v2 = vrot.slane %v705_v55, %v1804_v42 }
 0x3b6   : > { %v748_v11 = vsel %vm604_vm12, %v735_v2, %v747_v8 }
 0x3b7   : > { %v708_v61 = vpop.permute.xlu0 %707 }
 0x3b8   : > { %v739_v4 = vrot.slane %v708_v61, %v1804_v42  ;;  %v1312_v61 = vpack.c.bf16 %v916_v60, %v915_v59 }
 0x3ba   : > { %v749_v17 = vsel %vm606_vm13, %v739_v4, %v748_v11 }
 0x3bb   : > { %v711_v10 = vpop.permute.xlu0 %710 }
 0x3bc   : > { %v743_v15 = vrot.slane %v711_v10, %v1804_v42 }
 0x3be   : > { %v750_v18 = vsel %vm608_vm14, %v743_v15, %v749_v17 }
 0x3bf   : > { %v752_v21 = vsel %vm611_vm15, %v750_v18, 0.0 }
 0x3c0   : > { %753 = vadd.xlane.f32.xlu0 %v752_v21 }
 0x44d   : > { %v754_v22 = vpop.xlane.xlu0 %753 }
 0x44e   : > { %1414 = vrcp.f32 %v754_v22 }
 0x458   : > { %v1415_v13 = vpop.eup %1414 }
 0x459   : > { %v780_v24 = vrot.slane %v1415_v13, %v638_v19  ;;  %v760_v33 = vrot.slane %v1415_v13, %v618_v63  ;;  %v764_v42 = vrot.slane %v1415_v13, %v622_v0  ;;  %v768_v38 = vrot.slane %v1415_v13, %v626_v1  ;;  %v903_v1 = vld [vmem:[#allocation5 + $0x10] sm:$0xff] }
 0x45a   : > { %v772_v23 = vrot.slane %v1415_v13, %v630_v5  ;;  %v776_v63 = vrot.slane %v1415_v13, %v634_v14  ;;  %v904_v5 = vld [vmem:[#allocation5 + $0x18] sm:$0xff]  ;;  %v788_v14 = vrot.slane %v1415_v13, %v646_v36  ;;  %v911_v36 = vld [vmem:[#allocation5 + $0x50] sm:$0xff] }
 0x45b   : > { %v802_v16 = vmul.f32 %v1409_v49, %v780_v24  ;;  %v797_v37 = vmul.f32 %v1399_v35, %v760_v33  ;;  %v798_v12 = vmul.f32 %v1401_v40, %v764_v42  ;;  %v799_v41 = vmul.f32 %v1403_v44, %v768_v38  ;;  %v901_v35 = vld [vmem:[#allocation5] sm:$0xff] }
 0x45c   : > { %v800_v19 = vmul.f32 %v1405_v47, %v772_v23  ;;  %v1291_v0 = vpack.c.bf16 %v902_v43, %v901_v35  ;;  %v801_v45 = vmul.f32 %v1407_v48, %v776_v63  ;;  %v784_v40 = vrot.slane %v1415_v13, %v642_v7  ;;  %v906_v48 = vld [vmem:[#allocation5 + $0x28] sm:$0xff] }
 0x45d   : > { %832 = vperm.xlu0 %1380, %v802_v16   ;;  %807 = vperm.xlu1 %1381, %v797_v37   ;;  %v1294_v44 = vpack.c.bf16 %v904_v5, %v903_v1  ;;  %v1297_v49 = vpack.c.bf16 %v906_v48, %v905_v20  ;;  %v804_v7 = vmul.f32 %v1854_v32, %v788_v14 }
 0x45e   : > { %1292 = vmatpush3.bf16.msra.mxu1 %v1291_v0  ;;  %v803_v47 = vmul.f32 %v1411_v50, %v784_v40  ;;  %v909_v50 = vld [vmem:[#allocation5 + $0x40] sm:$0xff]  ;;  %v1306_v55 = vpack.c.bf16 %v912_v54, %v911_v36  ;;  %v1309_v32 = vpack.c.bf16 %v914_v57, %v913_v56 }
 0x45f   : > { %1293 = vmatprep.subr.bf16.mxu1 %v1549_v46  ;;  %v1303_v39 = vpack.c.bf16 %v910_v53, %v909_v50 }
 0x461   : > { %812 = vperm.xlu1 %1381, %v798_v12  }
 0x462   : > { %1295 = vmatpush3.bf16.msra.mxu1 %v1294_v44 }
 0x463   : > { %1296 = vmatprep.subr.bf16.mxu1 %v1549_v46 }
 0x465   : > { %817 = vperm.xlu1 %1381, %v799_v41  }
 0x466   : > { %1298 = vmatpush3.bf16.msra.mxu1 %v1297_v49 }
 0x467   : > { %1299 = vmatprep.subr.bf16.mxu1 %v1549_v46 }
 0x469   : > { %822 = vperm.xlu1 %1381, %v800_v19  }
 0x46a   : > { %1301 = vmatpush3.bf16.msra.mxu1 %v1300_v34 }
 0x46b   : > { %1302 = vmatprep.subr.bf16.mxu1 %v1549_v46 }
 0x46d   : > { %827 = vperm.xlu1 %1381, %v801_v45  }
 0x46e   : > { %1304 = vmatpush3.bf16.msra.mxu1 %v1303_v39 }
 0x46f   : > { %1305 = vmatprep.subr.bf16.mxu1 %v1549_v46 }
 0x471   : > { %837 = vperm.xlu1 %1381, %v803_v47  }
 0x472   : > { %1307 = vmatpush3.bf16.msra.mxu1 %v1306_v55 }
 0x473   : > { %1308 = vmatprep.subr.bf16.mxu1 %v1549_v46 }
 0x475   : > { %842 = vperm.xlu1 %1381, %v804_v7  }
 0x476   : > { %1310 = vmatpush3.bf16.msra.mxu1 %v1309_v32 }
 0x477   : > { %1311 = vmatprep.subr.bf16.mxu1 %v1549_v46 }
 0x47a   : > { %1313 = vmatpush3.bf16.msra.mxu1 %v1312_v61 }
 0x4dc   : > { %v808_v62 = vpop.permute.xlu1 %807  ;;  %v833_v6 = vpop.permute.xlu0 %832 }
 0x4dd   : > { %v845_v2 = vmul.f32 %v808_v62, %v1725_v9  ;;  %v850_v17 = vmul.f32 %v833_v6, %v1745_v29 }
 0x4df   : > { %v853_v10 = vrot.slane %v845_v2, 4  ;;  %v883_v33 = vrot.slane %v850_v17, 4 }
 0x4e0   : > { %v813_v3 = vpop.permute.xlu1 %812 }
 0x4e1   : > { %v846_v4 = vmul.f32 %v813_v3, %v1729_v25  ;;  %v854_v22 = vadd.f32 %v853_v10, %v845_v2  ;;  %v884_v41 = vadd.f32 %v883_v33, %v850_v17 }
 0x4e3   : > { %v859_v8 = vrot.slane %v846_v4, 4  ;;  %v855_v37 = vrot.slane %v854_v22, 2  ;;  %v885_v40 = vrot.slane %v884_v41, 2 }
 0x4e4   : > { %v818_v11 = vpop.permute.xlu1 %817 }
 0x4e5   : > { %v847_v15 = vmul.f32 %v818_v11, %v1732_v26  ;;  %v860_v18 = vadd.f32 %v859_v8, %v846_v4  ;;  %v856_v29 = vadd.f32 %v855_v37, %v854_v22  ;;  %v886_v7 = vadd.f32 %v885_v40, %v884_v41  ;;  %v1133_v11 = vld [vmem:[%s1961_s6] ss:$0 sm:$0xff] }
 0x4e7   : > { %v865_v21 = vrot.slane %v847_v15, 4  ;;  %v861_v9 = vrot.slane %v860_v18, 2  ;;  %v857_v44 = vrot.slane %v856_v29, 1  ;;  %v887_v56 = vrot.slane %v886_v7, 1 }
 0x4e8   : > { %v823_v13 = vpop.permute.xlu1 %822 }
 0x4e9   : > { %v866_v24 = vadd.f32 %v865_v21, %v847_v15  ;;  %v848_v16 = vmul.f32 %v823_v13, %v1737_v27  ;;  %v862_v26 = vadd.f32 %v861_v9, %v860_v18  ;;  %v888_v2 = vadd.f32 %v887_v56, %v886_v7 }
 0x4eb   : > { %v867_v42 = vrot.slane %v866_v24, 2  ;;  %v871_v25 = vrot.slane %v848_v16, 4  ;;  %v863_v46 = vrot.slane %v862_v26, 1 }
 0x4ec   : > { %v828_v12 = vpop.permute.xlu1 %827 }
 0x4ed   : > { %v849_v38 = vmul.f32 %v828_v12, %v1740_v28  ;;  %v872_v23 = vadd.f32 %v871_v25, %v848_v16  ;;  %v868_v63 = vadd.f32 %v867_v42, %v866_v24  ;;  %v864_v51 = vadd.f32 %v863_v46, %v862_v26 }
 0x4ef   : > { %v877_v19 = vrot.slane %v849_v38, 4  ;;  %v873_v35 = vrot.slane %v872_v23, 2  ;;  %v869_v47 = vrot.slane %v868_v63, 1 }
 0x4f0   : > { %v838_v43 = vpop.permute.xlu1 %837 }
 0x4f1   : > { %v878_v0 = vadd.f32 %v877_v19, %v849_v38  ;;  %v851_v45 = vmul.f32 %v838_v43, %v1748_v30  ;;  %v874_v27 = vadd.f32 %v873_v35, %v872_v23  ;;  %v870_v53 = vadd.f32 %v869_v47, %v868_v63 }
 0x4f2   : > { %v858_v30 = vadd.f32 %v857_v44, %v856_v29 }
 0x4f3   : > { %v879_v1 = vrot.slane %v878_v0, 2  ;;  %v889_v5 = vrot.slane %v851_v45, 4  ;;  %v875_v28 = vrot.slane %v874_v27, 1 }
 0x4f4   : > { %v843_v14 = vpop.permute.xlu1 %842  ;;  %v932_v57 = vsel %vm596_vm8, %v864_v51, %v858_v30 }
 0x4f5   : > { %v880_v20 = vadd.f32 %v879_v1, %v878_v0  ;;  %v890_v48 = vadd.f32 %v889_v5, %v851_v45  ;;  %v852_v49 = vmul.f32 %v843_v14, %v1753_v31  ;;  %v876_v39 = vadd.f32 %v875_v28, %v874_v27 }
 0x4f6   : > { %v933_v31 = vsel %vm598_vm9, %v870_v53, %v932_v57 }
 0x4f7   : > { %v881_v52 = vrot.slane %v880_v20, 1  ;;  %v891_v34 = vrot.slane %v890_v48, 2  ;;  %v895_v50 = vrot.slane %v852_v49, 4  ;;  %v934_v60 = vsel %vm600_vm10, %v876_v39, %v933_v31 }
 0x4f9   : > { %v892_v36 = vadd.f32 %v891_v34, %v890_v48  ;;  %v896_v54 = vadd.f32 %v895_v50, %v852_v49  ;;  %v882_v55 = vadd.f32 %v881_v52, %v880_v20 }
 0x4fb   : > { %v893_v32 = vrot.slane %v892_v36, 1  ;;  %v897_v58 = vrot.slane %v896_v54, 2  ;;  %v935_v62 = vsel %vm602_vm11, %v882_v55, %v934_v60 }
 0x4fc   : > { %v936_v6 = vsel %vm604_vm12, %v888_v2, %v935_v62 }
 0x4fd   : > { %v898_v59 = vadd.f32 %v897_v58, %v896_v54  ;;  %v894_v61 = vadd.f32 %v893_v32, %v892_v36 }
 0x4ff   : > { %v899_v3 = vrot.slane %v898_v59, 1  ;;  %v937_v8 = vsel %vm606_vm13, %v894_v61, %v936_v6 }
 0x501   : > { %v900_v4 = vadd.f32 %v899_v3, %v898_v59 }
 0x503   : > { %v938_v10 = vsel %vm608_vm14, %v900_v4, %v937_v8 }
 0x504   : > { %1256 = vmatmul.mubr.f32.vlgmr.msra.gmra.mrb[0].mxu1 %v938_v10 }
 0x5d7   : > { %v1006_v15 = vpop.f32.mrb[0].mxu1 }
 0x5d8   : > { %v1007_v17 = vadd.f32 %v1133_v11, %v1006_v15  ;;  %v1257_v18 = vpop.f32.mrb[1].mxu1 }
 0x5da   : > { %1010 = vst [vmem:[%s318_s18] sm:$0xff] %v1007_v17 }
 0x5db   : > { %1485 = shalt.err (!%p1482_p11)
}
 0x5dc   : > { %s1486_s9 = scalar_lea.hbm %s1913_s21, 128  ;;  %s1490_s19 = scalar_lea.hbm %s1962_s7, 256 }
 0x5dd   : > { %p1487_p13 = scmp.ne.s32.totalorder %s1913_s21, %s1486_s9  ;;  %p1491_p6 = scmp.lt.u32.totalorder %s1913_s21, %s1962_s7 }
 0x5de   : > { %p1492_p9 = scmp.lt.u32.totalorder %s1490_s19, %s1486_s9  ;;  %p1494_p12 = scmp.lt.u32.totalorder %s1486_s9, %s1913_s21 }
 0x5df   : > { %p1488_p5 = pnand %p1487_p13, %p1976_p1 }
 0x5e0   : > { %p1493_p10 = por %p1492_p9, %p1491_p6 }
 0x5e1   : > { %p1489_p0 = pneg %p1488_p5 }
 0x5e2   : > { %p1495_p2 = por %p1494_p12, %p1493_p10 }
 0x5e4   : > { %p1496_p3 = pnand %p1495_p2, %p1489_p0 }
 0x5e6   : > { %1499 = shalt.err (!%p1496_p3)
}
 0x5e7   : > { %1322 = dma.vmem_to_hbm [thread:$0]  (%p1976_p1), %s1915_s14, 128, %s1913_s21, %s1012_s22  }
 0x5e8 PF: > { %p1339_p4 = scmp.ge.s32.totalorder %s1542_s27, 2  ;;  %s1037_s18 = sand.u32 1, %s1530_s24  }
 0x5e9   : > { %p1977_p7 = scmp.ne.s32.totalorder %s1968_s12, 0  ;;  %s1038_s17 = scalar_lea.sflag [#allocation4], %s1037_s18 }
 0x5eb   : > { %p1332_p8 = pnand %p1339_p4, %p1977_p7 }
 0x5ed   : > { %1525 = dma.done.wait (!%p1332_p8), %s1038_s17, 128  }
 0x5ee   : > { %1527 = vsyncadd (!%p1332_p8), %s1038_s17, 4294967168  ;;  %s1978_s20 = sld [smem:[#allocation11_spill]]  ;;  %p19_p11 = scmp.ge.s32.totalorder %s1618_s30, 4  }
 0x5ef   : > { %s1979_s24 = smov %s1534_s25  ;;  %s1980_s25 = smov %s1538_s26 }
 0x5f0   : > { %s1982_s27 = smov %s1618_s30  ;;  %21 = sbr.rel (!%p19_p11) target bundleno = 5 (0x5), region = 95 }
 0x5f4   : > { %s1981_s26 = smov %s1978_s20 }
 0x5f7   :  { %1043 = vsyncpa [#allocation3], 1 }
 0x5f8   :  { %1045 = vsyncpa [#allocation3 + $0x1], 1 }
 0x5f9   :  { %1046 = vsyncpa [#allocation6], 1 }
 0x5fa   :  { %1047 = vsyncpa [#allocation4], 1 }
 0x5fb   :  { %1049 = vsyncpa [#allocation4 + $0x1], 1 }

</bundles_post_ra>
